<compile_context>
chip_gen: v6e
topology: v6e:2x2x1
jax: 0.10.0
libtpu: 0.0.40
codegen_flags: <defaults>
</compile_context>

<pallas_src>
import jax
import jax.numpy as jnp
from jax.experimental import pallas as pl
from jax.experimental.pallas import tpu as pltpu


_VREG = (8, 128)  # one full f32 vreg tile


# --------------------------------------------------------------------------------------
# Kernels
# --------------------------------------------------------------------------------------

def cost_kernel(x_ref, y_ref, z_ref):
    """Forward-only cost, elementwise over lane-dense tiles.

    Works for both layouts:
      * full tiles:   x_ref, y_ref = (tm, tn)        -> z (tm, tn)
      * mesh tiles:   x_ref = (tm, 1), y_ref = (1, tn) -> broadcast to z (tm, tn)
    """
    x = x_ref[...]
    y = y_ref[...]
    a = x * x                  # x^2
    b = 3.0 * (y * y)          # 3*y^2
    xy = x * y
    xpy = x + y
    # -sin(a)*cos(b) == -0.5*(sin(a+b) + sin(a-b))  (exact product-to-sum identity)
    sin_prod = 0.5 * (jnp.sin(a + b) + jnp.sin(a - b))
    z_ref[...] = -(sin_prod * jnp.exp(-(xy * xy))) - jnp.exp(-(xpy * xpy))


def scalar_cost_grad_kernel(p_ref, out_ref):
    """Fused forward + analytic gradient for the scalar (optimizer-step) path.

    p_ref  : SMEM (2,) f32  -- [x, y]; broadcast to a vreg inside the kernel.
    out_ref: VMEM (3, 8, 128) f32 -- out[0]=z, out[1]=dz/dx, out[2]=dz/dy (all-equal
             lanes; the host reads element [.,0,0]).
    Shared trig/exp factors and grad sub-terms are CSE'd (6 EUP transcendentals total).
    """
    x = jnp.full(_VREG, p_ref[0], jnp.float32)
    y = jnp.full(_VREG, p_ref[1], jnp.float32)
    x2 = x * x
    y2 = y * y
    xy = x * y
    xpy = x + y
    sin_x2 = jnp.sin(x2)
    cos_x2 = jnp.cos(x2)
    sin_3y2 = jnp.sin(3.0 * y2)
    cos_3y2 = jnp.cos(3.0 * y2)
    e1 = jnp.exp(-(xy * xy))        # exp(-(x*y)^2)
    e2 = jnp.exp(-(xpy * xpy))      # exp(-(x+y)^2)
    se = sin_x2 * e1                # sin(x^2)*e1            (shared)
    cc = cos_3y2 * e1               # cos(3y^2)*e1           (shared)
    s = se * cos_3y2                # sin(x^2)cos(3y^2)e1    (shared)
    t = (2.0 * xpy) * e2            # shared between both grads
    u = (2.0 * xy) * s              # u*y, u*x are the e1' chain terms
    out_ref[0] = -s - e2
    out_ref[1] = u * y - (2.0 * x) * (cos_x2 * cc) + t
    out_ref[2] = u * x + (6.0 * y) * (se * sin_3y2) + t


# --------------------------------------------------------------------------------------
# Tiling helpers
# --------------------------------------------------------------------------------------

def _round_up(v, m):
    return ((v + m - 1) // m) * m


def _largest_tile(size, unit, cap):
    """Largest divisor of `size` that is a multiple of `unit` and <= cap.

    `size` is guaranteed to be a multiple of `unit`, and `cap` >= `unit`.
    """
    d = size // unit
    best = unit
    for k in range(1, d + 1):
        if d % k == 0 and k * unit <= cap:
            best = k * unit
    return best


# --------------------------------------------------------------------------------------
# Batched surface evaluation (the workload that amortizes the launch cost)
# --------------------------------------------------------------------------------------

def cost_surface(x_pts, y_pts, *, vmem_budget_bytes=12 * 1024 * 1024):
    """Evaluate cost_func z on a whole batch of (x, y) points given as (M, N) arrays.

    x and y are separate inputs (no stacking pass), padding is only to the (8,128)
    vreg tile, and tiles are exact divisors of the aligned shape: full contiguous rows
    when they fit, tile_m capped at 512, double-buffered working set <= ~12 MiB
    (safe on v5e/v6e 128 MiB and v7x 64 MiB VMEM).
    """
    x_pts = jnp.asarray(x_pts, jnp.float32)
    y_pts = jnp.asarray(y_pts, jnp.float32)
    assert x_pts.shape == y_pts.shape and x_pts.ndim == 2
    m, n = x_pts.shape
    mp, np_ = _round_up(m, 8), _round_up(n, 128)
    if (mp, np_) != (m, n):
        x_pts = jnp.pad(x_pts, ((0, mp - m), (0, np_ - n)))
        y_pts = jnp.pad(y_pts, ((0, mp - m), (0, np_ - n)))

    # Per grid step: x + y + z blocks, each double-buffered -> ~24 B per element.
    max_elems = max(8 * 128, vmem_budget_bytes // 24)
    tn = _largest_tile(np_, 128, max(128, max_elems // 8))          # prefer full rows
    tm = _largest_tile(mp, 8, max(8, min(512, max_elems // tn)))    # keep >1 block for v7x
    grid = (mp // tm, np_ // tn)

    z = pl.pallas_call(
        cost_kernel,
        out_shape=jax.ShapeDtypeStruct((mp, np_), jnp.float32),
        grid_spec=pltpu.PrefetchScalarGridSpec(
            num_scalar_prefetch=0,
            grid=grid,
            in_specs=[pl.BlockSpec((tm, tn), lambda i, j: (i, j)),
                      pl.BlockSpec((tm, tn), lambda i, j: (i, j))],
            out_specs=pl.BlockSpec((tm, tn), lambda i, j: (i, j)),
        ),
        compiler_params=pltpu.CompilerParams(
            dimension_semantics=("parallel", "parallel")),
    )(x_pts, y_pts)
    return z[:m, :n]


def cost_surface_mesh(x_1d, y_1d, *, vmem_budget_bytes=12 * 1024 * 1024):
    """Meshgrid surface: z[i, j] = cost(x_1d[i], y_1d[j]) without materializing (M, N)
    coordinate arrays.  Input HBM traffic is ~0; only the 4 B/elem output store remains.
    """
    x_1d = jnp.asarray(x_1d, jnp.float32).reshape(-1)
    y_1d = jnp.asarray(y_1d, jnp.float32).reshape(-1)
    m, n = x_1d.shape[0], y_1d.shape[0]
    mp, np_ = _round_up(m, 8), _round_up(n, 128)
    if mp != m:
        x_1d = jnp.pad(x_1d, (0, mp - m))
    if np_ != n:
        y_1d = jnp.pad(y_1d, (0, np_ - n))
    x_col = x_1d.reshape(mp, 1)     # (tm, 1) blocks, broadcast along lanes in-kernel
    y_row = y_1d.reshape(1, np_)    # (1, tn) blocks, broadcast along sublanes in-kernel

    # Output block dominates traffic; double-buffered -> ~8 B per element.
    max_elems = max(8 * 128, vmem_budget_bytes // 8)
    tn = _largest_tile(np_, 128, max(128, max_elems // 8))
    tm = _largest_tile(mp, 8, max(8, min(512, max_elems // tn)))
    grid = (mp // tm, np_ // tn)

    z = pl.pallas_call(
        cost_kernel,
        out_shape=jax.ShapeDtypeStruct((mp, np_), jnp.float32),
        grid_spec=pltpu.PrefetchScalarGridSpec(
            num_scalar_prefetch=0,
            grid=grid,
            in_specs=[pl.BlockSpec((tm, 1), lambda i, j: (i, 0)),
                      pl.BlockSpec((1, tn), lambda i, j: (0, j))],
            out_specs=pl.BlockSpec((tm, tn), lambda i, j: (i, j)),
        ),
        compiler_params=pltpu.CompilerParams(
            dimension_semantics=("parallel", "parallel")),
    )(x_col, y_row)
    return z[:m, :n]


# --------------------------------------------------------------------------------------
# Scalar module forward (SimpleModel.forward) + fused analytic gradient (custom_vjp)
# --------------------------------------------------------------------------------------

def _scalar_value_and_grad(x, y):
    """One fused launch: (z, dz/dx, dz/dy).  Scalars travel in SMEM; the vreg broadcast
    happens inside the kernel (no host-side jnp.full/stack stage on the critical path)."""
    p = jnp.stack([jnp.asarray(x, jnp.float32), jnp.asarray(y, jnp.float32)])  # (2,)
    out = pl.pallas_call(
        scalar_cost_grad_kernel,
        out_shape=jax.ShapeDtypeStruct((3,) + _VREG, jnp.float32),
        in_specs=[pl.BlockSpec(memory_space=pltpu.MemorySpace.SMEM)],
        out_specs=pl.BlockSpec((3,) + _VREG, lambda: (0, 0, 0)),
    )(p)
    return out[0, 0, 0], out[1, 0, 0], out[2, 0, 0]


@jax.custom_vjp
def simple_model_forward(x, y):
    """Pallas equivalent of SimpleModel.forward(): scalar x, y -> scalar z."""
    z, _, _ = _scalar_value_and_grad(x, y)
    return z


def _forward_fwd(x, y):
    z, dzdx, dzdy = _scalar_value_and_grad(x, y)
    return z, (dzdx, dzdy)


def _forward_bwd(res, g):
    dzdx, dzdy = res
    return (g * dzdx, g * dzdy)


simple_model_forward.defvjp(_forward_fwd, _forward_bwd)


# --------------------------------------------------------------------------------------
# Pure-JAX reference
# --------------------------------------------------------------------------------------

def reference_forward(x, y):
    x = jnp.asarray(x, jnp.float32)
    y = jnp.asarray(y, jnp.float32)
    return (-jnp.sin(x * x) * jnp.cos(3.0 * y * y) * jnp.exp(-(x * y) * (x * y))
            - jnp.exp(-(x + y) * (x + y)))


# TODO(synk): SimpleModel.process()/getGrads()/getWeights() are host-side optimizer
# bookkeeping (numpy + torch.optim); they stay outside the kernel by design.

if __name__ == "__main__":
    key = jax.random.PRNGKey(0)
    kx, ky, kbx, kby = jax.random.split(key, 4)

    # Deterministic scalar parameters of SimpleModel.
    x0 = jax.random.uniform(kx, (), jnp.float32, minval=-2.0, maxval=2.0)
    y0 = jax.random.uniform(ky, (), jnp.float32, minval=-2.0, maxval=2.0)

    # 1) Module forward (scalar z).
    z = jax.block_until_ready(simple_model_forward(x0, y0))
    z_ref = reference_forward(x0, y0)
    assert jnp.allclose(z, z_ref, atol=1e-5, rtol=1e-5), (z, z_ref)

    # 2) Fused forward + analytic grads (what z.backward() needs), via custom_vjp.
    z_v, (gx, gy) = jax.value_and_grad(simple_model_forward, argnums=(0, 1))(x0, y0)
    jax.block_until_ready((z_v, gx, gy))
    gx_ref, gy_ref = jax.grad(reference_forward, argnums=(0, 1))(x0, y0)
    assert jnp.allclose(z_v, z_ref, atol=1e-5, rtol=1e-5), (z_v, z_ref)
    assert jnp.allclose(gx, gx_ref, atol=1e-4, rtol=1e-3), (gx, gx_ref)
    assert jnp.allclose(gy, gy_ref, atol=1e-4, rtol=1e-3), (gy, gy_ref)

    # 3) Batched surface evaluation on explicit (M, N) point arrays
    #    (120x500 -> (8,128)-aligned 128x512, single row-contiguous block per step).
    bx = jax.random.uniform(kbx, (120, 500), jnp.float32, minval=-2.0, maxval=2.0)
    by = jax.random.uniform(kby, (120, 500), jnp.float32, minval=-2.0, maxval=2.0)
    z_surf = jax.block_until_ready(cost_surface(bx, by))
    z_surf_ref = reference_forward(bx, by)
    assert z_surf.shape == bx.shape
    assert jnp.allclose(z_surf, z_surf_ref, atol=1e-5, rtol=1e-5), "surface mismatch"

    # 4) Meshgrid surface from 1-D axes (inputs broadcast inside the kernel).
    mx = jnp.linspace(-2.0, 2.0, 120, dtype=jnp.float32)
    my = jnp.linspace(-2.0, 2.0, 500, dtype=jnp.float32)
    z_mesh = jax.block_until_ready(cost_surface_mesh(mx, my))
    z_mesh_ref = reference_forward(mx[:, None], my[None, :])
    assert z_mesh.shape == (120, 500)
    assert jnp.allclose(z_mesh, z_mesh_ref, atol=1e-5, rtol=1e-5), "mesh mismatch"

    print("KERNEL_OK")
</pallas_src>

<mosaic_0001>
module attributes {stable_mosaic.version = 11 : i64} {
  func.func @scalar_cost_grad_kernel(%arg0: memref<2xf32, #tpu.memory_space<smem>>, %arg1: memref<3x8x128xf32, #tpu.memory_space<vmem>>) attributes {dimension_semantics = [], scalar_prefetch = 0 : i64, scratch_operands = 0 : i64, tpu.core_type = #tpu.core_type<tc>} {
    %c0 = arith.constant 0 : index
    %0 = memref.load %arg0[%c0] : memref<2xf32, #tpu.memory_space<smem>>
    %1 = vector.broadcast %0 : f32 to vector<8x128xf32>
    %c1 = arith.constant 1 : index
    %2 = memref.load %arg0[%c1] : memref<2xf32, #tpu.memory_space<smem>>
    %3 = vector.broadcast %2 : f32 to vector<8x128xf32>
    %4 = arith.mulf %1, %1 : vector<8x128xf32>
    %5 = arith.mulf %3, %3 : vector<8x128xf32>
    %6 = arith.mulf %1, %3 : vector<8x128xf32>
    %7 = arith.addf %1, %3 : vector<8x128xf32>
    %8 = math.sin %4 : vector<8x128xf32>
    %9 = math.cos %4 : vector<8x128xf32>
    %cst = arith.constant 3.000000e+00 : f32
    %10 = vector.broadcast %cst : f32 to vector<8x128xf32>
    %11 = arith.mulf %10, %5 : vector<8x128xf32>
    %12 = math.sin %11 : vector<8x128xf32>
    %cst_0 = arith.constant 3.000000e+00 : f32
    %13 = vector.broadcast %cst_0 : f32 to vector<8x128xf32>
    %14 = arith.mulf %13, %5 : vector<8x128xf32>
    %15 = math.cos %14 : vector<8x128xf32>
    %16 = arith.mulf %6, %6 : vector<8x128xf32>
    %cst_1 = arith.constant 0.000000e+00 : f32
    %17 = vector.broadcast %cst_1 : f32 to vector<8x128xf32>
    %18 = arith.subf %17, %16 : vector<8x128xf32>
    %19 = math.exp %18 : vector<8x128xf32>
    %20 = arith.mulf %7, %7 : vector<8x128xf32>
    %cst_2 = arith.constant 0.000000e+00 : f32
    %21 = vector.broadcast %cst_2 : f32 to vector<8x128xf32>
    %22 = arith.subf %21, %20 : vector<8x128xf32>
    %23 = math.exp %22 : vector<8x128xf32>
    %24 = arith.mulf %8, %19 : vector<8x128xf32>
    %25 = arith.mulf %15, %19 : vector<8x128xf32>
    %26 = arith.mulf %24, %15 : vector<8x128xf32>
    %cst_3 = arith.constant 2.000000e+00 : f32
    %27 = vector.broadcast %cst_3 : f32 to vector<8x128xf32>
    %28 = arith.mulf %27, %7 : vector<8x128xf32>
    %29 = arith.mulf %28, %23 : vector<8x128xf32>
    %cst_4 = arith.constant 2.000000e+00 : f32
    %30 = vector.broadcast %cst_4 : f32 to vector<8x128xf32>
    %31 = arith.mulf %30, %6 : vector<8x128xf32>
    %32 = arith.mulf %31, %26 : vector<8x128xf32>
    %cst_5 = arith.constant 0.000000e+00 : f32
    %33 = vector.broadcast %cst_5 : f32 to vector<8x128xf32>
    %34 = arith.subf %33, %26 : vector<8x128xf32>
    %35 = arith.subf %34, %23 : vector<8x128xf32>
    %c0_6 = arith.constant 0 : index
    %c0_7 = arith.constant 0 : index
    %c0_8 = arith.constant 0 : index
    %36 = vector.load %arg1[%c0_6, %c0_7, %c0_8] : memref<3x8x128xf32, #tpu.memory_space<vmem>>, vector<1x8x128xf32>
    %37 = vector.shape_cast %36 : vector<1x8x128xf32> to vector<8x128xf32>
    %38 = vector.shape_cast %35 : vector<8x128xf32> to vector<1x8x128xf32>
    tpu.vector_store %arg1[%c0_6, %c0_7, %c0_8], %38 {strides = array<i32>} : memref<3x8x128xf32, #tpu.memory_space<vmem>>, vector<1x8x128xf32>,
    %39 = arith.mulf %32, %3 : vector<8x128xf32>
    %cst_9 = arith.constant 2.000000e+00 : f32
    %40 = vector.broadcast %cst_9 : f32 to vector<8x128xf32>
    %41 = arith.mulf %40, %1 : vector<8x128xf32>
    %42 = arith.mulf %9, %25 : vector<8x128xf32>
    %43 = arith.mulf %41, %42 : vector<8x128xf32>
    %44 = arith.subf %39, %43 : vector<8x128xf32>
    %45 = arith.addf %44, %29 : vector<8x128xf32>
    %c1_10 = arith.constant 1 : index
    %c0_11 = arith.constant 0 : index
    %c0_12 = arith.constant 0 : index
    %46 = vector.load %arg1[%c1_10, %c0_11, %c0_12] : memref<3x8x128xf32, #tpu.memory_space<vmem>>, vector<1x8x128xf32>
    %47 = vector.shape_cast %46 : vector<1x8x128xf32> to vector<8x128xf32>
    %48 = vector.shape_cast %45 : vector<8x128xf32> to vector<1x8x128xf32>
    tpu.vector_store %arg1[%c1_10, %c0_11, %c0_12], %48 {strides = array<i32>} : memref<3x8x128xf32, #tpu.memory_space<vmem>>, vector<1x8x128xf32>,
    %49 = arith.mulf %32, %1 : vector<8x128xf32>
    %cst_13 = arith.constant 6.000000e+00 : f32
    %50 = vector.broadcast %cst_13 : f32 to vector<8x128xf32>
    %51 = arith.mulf %50, %3 : vector<8x128xf32>
    %52 = arith.mulf %24, %12 : vector<8x128xf32>
    %53 = arith.mulf %51, %52 : vector<8x128xf32>
    %54 = arith.addf %49, %53 : vector<8x128xf32>
    %55 = arith.addf %54, %29 : vector<8x128xf32>
    %c2 = arith.constant 2 : index
    %c0_14 = arith.constant 0 : index
    %c0_15 = arith.constant 0 : index
    %56 = vector.load %arg1[%c2, %c0_14, %c0_15] : memref<3x8x128xf32, #tpu.memory_space<vmem>>, vector<1x8x128xf32>
    %57 = vector.shape_cast %56 : vector<1x8x128xf32> to vector<8x128xf32>
    %58 = vector.shape_cast %55 : vector<8x128xf32> to vector<1x8x128xf32>
    tpu.vector_store %arg1[%c2, %c0_14, %c0_15], %58 {strides = array<i32>} : memref<3x8x128xf32, #tpu.memory_space<vmem>>, vector<1x8x128xf32>,
    return
  }
}

</mosaic_0001>

<bundles_post_ra>
// kernel: tpu_custom_call.1
= control target key start
LH: loop header
LB: loop body
LE: loop exit
PB: predicated region body
PF: predicated region fallthrough
CT: control target
= control target key end

     0   :  { %6 = vsyncpa [#allocation4], 0  ;;  %s710_s0 = inlined_call_operand.hbm [shape: f32[2], index: 0, kind: input, shape index: {}]   ;;  %s711_s1 = inlined_call_operand.hbm [shape: f32[3,8,128], index: 1, kind: output, shape index: {}]  }
   0x1   :  { %7 = vsyncpa [#allocation3], 0  ;;  %s573_s6 = smov [#allocation2]  }
   0x2   :  { %15 = dma.hbm_to_smem %s710_s0, 16, %s573_s6, [#allocation4]  }
   0x3   :  { %569 = dma.done.wait [#allocation4], 16  }
   0x4   :  { %570 = vsyncadd [#allocation4], 4294967280 }
   0x5   :  { %19 = sfence }
   0x6   :  { %s20_s9 = sld [smem:[#allocation2]]  ;;  %v574_v24 = vmov 683565275   ;;  %v575_v26 = vmov 2475754826   ;;  %s580_s0 = smov [#allocation5]  }
   0x7   :  { %s494_s10 = sld [smem:[#allocation2 + $0x1]]  ;;  %v576_v28 = vmov 2131351028   ;;  %v577_v30 = vmov 2102212464   ;;  %s482_s11 = sshll.u32 %s580_s0, 4  ;;  %s483_s11 = int_to_ptr.vmem [resolvable:$true] %s482_s11 }
   0x8   :  { %v578_v32 = vmov 920167782   ;;  %v579_v39 = vmov 1326507024   ;;  %s549_s12 = scalar_lea.vmem %s483_s11, 384  ;;  %p554_p1 = scmp.lt.s32.totalorder %s483_s11, %s483_s11 }
   0x9   :  { %p550_p0 = scmp.ne.s32.totalorder %s483_s11, %s549_s12  ;;  %p555_p2 = scmp.lt.s32.totalorder %s549_s12, %s549_s12 }
   0xb   :  { %p556_p3 = por %p555_p2, %p554_p1 }
   0xc   :  { %v596_v0 = vstv %s20_s9 }
   0xd   :  { %v598_v1 = vstv %s494_s10  ;;  %v602_v2 = vmul.f32 %v596_v0, %v596_v0  ;;  %p557_p4 = pnand %p556_p3, %p550_p0 }
   0xe   :  { %v25_v3 = vmul.f32 %v598_v1, %v598_v1 }
   0xf   :  { %v28_v4 = vand.u32 2147483647, %v602_v2  ;;  %v31_v5 = vand.u32 2139095040, %v602_v2  ;;  %vm30_vm14 = vcmp.lt.s32.totalorder %v602_v2, 0 }
  0x10   :  { %v608_v6 = vmul.f32 3.0, %v25_v3 }
  0x11   :  { %v32_v7 = vshrl.u32 %v31_v5, 23  ;;  %v35_v8 = vand.u32 8388607, %v28_v4  ;;  %vm669_vm15 = vcmp.le.f32.partialorder %v28_v4, 0.7853982 }
  0x12   :  { %v236_v9 = vand.u32 2147483647, %v608_v6  ;;  %v239_v10 = vand.u32 2139095040, %v608_v6 }
  0x13   :  { %v495_v11 = vadd.s32 4294967169, %v32_v7  ;;  %v36_v14 = vor.u32 8388608, %v35_v8 }
  0x14   :  { %v240_v12 = vshrl.u32 %v239_v10, 23  ;;  %v616_v16 = vand.u32 8388607, %v236_v9 }
  0x15   :  { %v38_v13 = vadd.s32 1, %v495_v11  ;;  %v618_v21 = vshll.u32 %v36_v14, 8 }
  0x16   :  { %v503_v15 = vadd.s32 4294967169, %v240_v12  ;;  %v244_v22 = vor.u32 8388608, %v616_v16 }
  0x17   :  { %vm39_vm0 = vcmp.gt.s32.totalorder %v38_v13, 0 }
  0x18   :  { %v40_v17 = vsel %vm39_vm0, %v38_v13, 0  ;;  %v246_v18 = vadd.s32 1, %v503_v15  ;;  %vm238_vm0 = vcmp.lt.s32.totalorder %v608_v6, 0 }
  0x19   :  { %v41_v19 = vshrl.u32 %v40_v17, 5  ;;  %v42_v20 = vand.u32 31, %v40_v17 }
  0x1a   :  { %vm247_vm1 = vcmp.gt.s32.totalorder %v246_v18, 0 }
  0x1b   :  { %v43_v23 = vsub.s32 32, %v42_v20  ;;  %v45_v25 = vshll.u32 %v574_v24, %v42_v20  ;;  %v48_v27 = vshll.u32 %v575_v26, %v42_v20  ;;  %v51_v29 = vshll.u32 %v576_v28, %v42_v20 }
  0x1c   :  { %v54_v31 = vshll.u32 %v577_v30, %v42_v20  ;;  %v57_v33 = vshll.u32 %v578_v32, %v42_v20  ;;  %vm60_vm2 = vcmp.lt.s32.totalorder %v41_v19, 1  ;;  %vm61_vm3 = vcmp.lt.s32.totalorder %v41_v19, 2 }
  0x1d   :  { %v44_v34 = vshrl.u32 %v574_v24, %v43_v23  ;;  %v46_v35 = vshrl.u32 %v575_v26, %v43_v23  ;;  %v49_v36 = vshrl.u32 %v576_v28, %v43_v23  ;;  %v52_v37 = vshrl.u32 %v577_v30, %v43_v23 }
  0x1e   :  { %v55_v38 = vshrl.u32 %v578_v32, %v43_v23  ;;  %v58_v40 = vshrl.u32 %v579_v39, %v43_v23  ;;  %vm62_vm4 = vcmp.lt.s32.totalorder %v41_v19, 3  ;;  %vm63_vm5 = vcmp.lt.s32.totalorder %v41_v19, 4 }
  0x1f   :  { %v47_v41 = vor.u32 %v46_v35, %v45_v25  ;;  %v50_v42 = vor.u32 %v49_v36, %v48_v27  ;;  %v53_v43 = vor.u32 %v52_v37, %v51_v29  ;;  %v248_v44 = vsel %vm247_vm1, %v246_v18, 0 }
  0x20   :  { %v56_v45 = vor.u32 %v55_v38, %v54_v31  ;;  %v59_v46 = vor.u32 %v58_v40, %v57_v33  ;;  %v249_v47 = vshrl.u32 %v248_v44, 5  ;;  %v250_v48 = vand.u32 31, %v248_v44 }
  0x21   :  { %v64_v49 = vsel %vm60_vm2, %v44_v34, %v47_v41  ;;  %v65_v50 = vsel %vm63_vm5, %v53_v43, 2102212464  ;;  %v68_v51 = vsel %vm60_vm2, %v47_v41, %v50_v42  ;;  %v72_v52 = vsel %vm60_vm2, %v50_v42, %v53_v43 }
  0x22   :  { %v66_v53 = vsel %vm62_vm4, %v50_v42, %v65_v50  ;;  %v69_v54 = vsel %vm63_vm5, %v56_v45, 920167782  ;;  %v73_v55 = vsel %vm63_vm5, %v59_v46, 1326507024  ;;  %v251_v56 = vsub.s32 32, %v250_v48 }
  0x23   :  { %v67_v57 = vsel %vm61_vm3, %v64_v49, %v66_v53  ;;  %v70_v58 = vsel %vm62_vm4, %v53_v43, %v69_v54  ;;  %v74_v59 = vsel %vm62_vm4, %v56_v45, %v73_v55  ;;  %v253_v60 = vshll.u32 %v574_v24, %v250_v48 }
  0x24   :  { %v71_v61 = vsel %vm61_vm3, %v68_v51, %v70_v58  ;;  %v75_v62 = vsel %vm61_vm3, %v72_v52, %v74_v59  ;;  %v83_v63 = vmul.u32 %v618_v21, %v67_v57  ;;  %v252_v3 = vshrl.u32 %v574_v24, %v251_v56 }
  0x25   :  { %v633_v5 = vmul.u32.u64.low %v618_v21, %v75_v62  ;;  %v634_v7 = vmul.u32.u64.high %v618_v21, %v75_v62, %v633_v5  ;;  %v637_v8 = vmul.u32.u64.low %v618_v21, %v71_v61  ;;  %v638_v10 = vmul.u32.u64.high %v618_v21, %v71_v61, %v637_v8 }
  0x26   :  { %v254_v11 = vshrl.u32 %v575_v26, %v251_v56  ;;  %v256_v12 = vshll.u32 %v575_v26, %v250_v48  ;;  %v257_v13 = vshrl.u32 %v576_v28, %v251_v56  ;;  %v259_v14 = vshll.u32 %v576_v28, %v250_v48 }
  0x27   :  { %v260_v15 = vshrl.u32 %v577_v30, %v251_v56  ;;  %v262_v17 = vshll.u32 %v577_v30, %v250_v48  ;;  %v263_v18 = vshrl.u32 %v578_v32, %v251_v56  ;;  %v265_v19 = vshll.u32 %v578_v32, %v250_v48 }
  0x28   :  { %v255_v20 = vor.u32 %v254_v11, %v253_v60  ;;  %v258_v23 = vor.u32 %v257_v13, %v256_v12  ;;  %v266_v25 = vshrl.u32 %v579_v39, %v251_v56  ;;  %vm268_vm6 = vcmp.lt.s32.totalorder %v249_v47, 1 }
  0x29   :  { %vm85_vm7 = vc.u32 %v634_v7, %v637_v8  ;;  %v86_v24 = vadd.s32 1, %v638_v10  ;;  %v261_v27 = vor.u32 %v260_v15, %v259_v14  ;;  %v284_v21 = vshll.u32 %v244_v22, 8 }
  0x2a   :  { %v264_v29 = vor.u32 %v263_v18, %v262_v17  ;;  %v267_v26 = vor.u32 %v266_v25, %v265_v19  ;;  %vm269_vm8 = vcmp.lt.s32.totalorder %v249_v47, 2  ;;  %vm270_vm9 = vcmp.lt.s32.totalorder %v249_v47, 3 }
  0x2b   :  { %v87_v28 = vsel %vm85_vm7, %v86_v24, %v638_v10  ;;  %vm271_vm10 = vcmp.lt.s32.totalorder %v249_v47, 4  ;;  %v272_v30 = vsel %vm268_vm6, %v252_v3, %v255_v20  ;;  %v276_v31 = vsel %vm268_vm6, %v255_v20, %v258_v23 }
  0x2c   :  { %v88_v32 = vadd.s32 %v87_v28, %v83_v63  ;;  %v273_v33 = vsel %vm271_vm10, %v261_v27, 2102212464  ;;  %v277_v34 = vsel %vm271_vm10, %v264_v29, 920167782  ;;  %v280_v35 = vsel %vm268_vm6, %v258_v23, %v261_v27 }
  0x2d   :  { %v274_v36 = vsel %vm270_vm9, %v258_v23, %v273_v33  ;;  %v278_v37 = vsel %vm270_vm9, %v261_v27, %v277_v34  ;;  %v281_v16 = vsel %vm271_vm10, %v267_v26, 1326507024  ;;  %v84_v60 = vadd.s32 %v637_v8, %v634_v7 }
  0x2e   :  { %v89_v22 = vadd.s32 536870912, %v88_v32  ;;  %v279_v38 = vsel %vm269_vm8, %v276_v31, %v278_v37  ;;  %v282_v39 = vsel %vm270_vm9, %v264_v29, %v281_v16  ;;  %v275_v40 = vsel %vm269_vm8, %v272_v30, %v274_v36 }
  0x2f   :  { %v283_v41 = vsel %vm269_vm8, %v280_v35, %v282_v39  ;;  %v651_v42 = vmul.u32.u64.low %v284_v21, %v279_v38  ;;  %v652_v43 = vmul.u32.u64.high %v284_v21, %v279_v38, %v651_v42  ;;  %v291_v49 = vmul.u32 %v284_v21, %v275_v40 }
  0x30   :  { %v90_v44 = vshrl.u32 %v89_v22, 30  ;;  %v654_v45 = vmul.u32.u64.low %v284_v21, %v283_v41  ;;  %v655_v46 = vmul.u32.u64.high %v284_v21, %v283_v41, %v654_v45  ;;  %v664_v7 = vmul.f32 %v598_v1, %v596_v0 }
  0x31   :  { %v294_v50 = vadd.s32 1, %v652_v43  ;;  %v680_v38 = vadd.f32 %v598_v1, %v596_v0  ;;  %vm237_vm1 = vcmp.le.f32.partialorder %v236_v9, 0.7853982  ;;  %vm120_vm5 = vweird.f32 %v602_v2 }
  0x32   :  { %v91_v48 = vshll.u32 %v90_v44, 30  ;;  %vm293_vm11 = vc.u32 %v655_v46, %v651_v42  ;;  %v292_v25 = vadd.s32 %v651_v42, %v655_v46  ;;  %v114_v30 = vsub.s32 4, %v90_v44 }
  0x33   :  { %v295_v52 = vsel %vm293_vm11, %v294_v50, %v652_v43  ;;  %v443_v34 = vmul.f32 %v664_v7, %v664_v7 }
  0x34   :  { %v92_v51 = vsub.s32 %v88_v32, %v91_v48  ;;  %v296_v54 = vadd.s32 %v295_v52, %v291_v49  ;;  %v115_v16 = vsel %vm30_vm14, %v114_v30, %v90_v44  ;;  %v447_v44 = vmul.f32 %v680_v38, %v680_v38 }
  0x35   :  { %v444_v39 = vsub.f32 0.0, %v443_v34  ;;  %v117_v41 = vsel %vm669_vm15, 0, %v115_v16 }
  0x36   :  { %v94_v53 = vsub.s32 0, %v92_v51  ;;  %v297_v55 = vadd.s32 536870912, %v296_v54  ;;  %v121_v46 = vadd.s32 3, %v117_v41  ;;  %v448_v52 = vsub.f32 0.0, %v447_v44 }
  0x37   :  { %v445_v45 = vmul.f32 1.442695, %v444_v39  ;;  %v225_v9 = vand.u32 3, %v117_v41 }
  0x38   :  { %v496_v47 = vmin.u32 %v94_v53, %v92_v51  ;;  %v298_v57 = vshrl.u32 %v297_v55, 30  ;;  %v122_v53 = vand.u32 3, %v121_v46 }
  0x39   :  { %vm227_vm6 = vcmp.eq.s32.totalorder %v225_v9, 0  ;;  %vm230_vm7 = vcmp.eq.s32.totalorder %v225_v9, 2  ;;  %vm226_vm8 = vcmp.lt.s32.totalorder %v225_v9, 2 }
  0x3a   :  { %v96_v56 = vclz %v496_v47  ;;  %v299_v59 = vshll.u32 %v298_v57, 30  ;;  %v322_v43 = vsub.s32 4, %v298_v57  ;;  %vm124_vm2 = vcmp.eq.s32.totalorder %v122_v53, 0 }
  0x3b   :  { %vm127_vm3 = vcmp.eq.s32.totalorder %v122_v53, 2  ;;  %vm123_vm4 = vcmp.lt.s32.totalorder %v122_v53, 2 }
  0x3c   :  { %v497_v58 = vadd.s32 4294967294, %v96_v56  ;;  %v300_v62 = vsub.s32 %v296_v54, %v299_v59  ;;  %v323_v50 = vsel %vm238_vm0, %v322_v43, %v298_v57 }
  0x3d   :  { %v325_v47 = vsel %vm237_vm1, 0, %v323_v50 }
  0x3e   :  { %vm498_vm12 = vcmp.lt.s32.totalorder %v497_v58, 0  ;;  %v302_v10 = vsub.s32 0, %v300_v62 }
  0x3f   :  { %v99_v61 = vsel %vm498_vm12, 0, %v497_v58  ;;  %v449_v58 = vmul.f32 1.442695, %v448_v52 }
  0x40   :  { %v100_v63 = vsub.s32 32, %v99_v61  ;;  %v101_v3 = vshll.u32 %v92_v51, %v99_v61  ;;  %v104_v5 = vsub.s32 4294967266, %v99_v61  ;;  %v504_v13 = vmin.u32 %v302_v10, %v300_v62 }
  0x42   :  { %v102_v11 = vshrl.u32 %v84_v60, %v100_v63  ;;  %v105_v12 = vadd.s32 127, %v104_v5  ;;  %v304_v17 = vclz %v504_v13  ;;  %v329_v60 = vadd.s32 3, %v325_v47 }
  0x44   :  { %v103_v14 = vor.u32 %v102_v11, %v101_v3  ;;  %v106_v15 = vshll.u32 %v105_v12, 23  ;;  %v505_v20 = vadd.s32 4294967294, %v304_v17  ;;  %v330_v63 = vand.u32 3, %v329_v60 }
  0x46   :  { %v107_v18 = vor.u32 4788187, %v106_v15  ;;  %v110_v19 = vcvt.s32.f32 %v103_v14  ;;  %vm506_vm13 = vcmp.lt.s32.totalorder %v505_v20, 0  ;;  %vm335_vm10 = vcmp.eq.s32.totalorder %v330_v63, 2 }
  0x47   :  { %v307_v24 = vsel %vm506_vm13, 0, %v505_v20  ;;  %vm332_vm11 = vcmp.eq.s32.totalorder %v330_v63, 0  ;;  %vm328_vm13 = vweird.f32 %v608_v6 }
  0x48   :  { %v108_v23 = vand.u32 2147483647, %v107_v18  ;;  %v308_v27 = vsub.s32 32, %v307_v24  ;;  %v309_v21 = vshll.u32 %v300_v62, %v307_v24  ;;  %v312_v29 = vsub.s32 4294967266, %v307_v24 }
  0x49   :  { %v433_v62 = vand.u32 3, %v325_v47 }
  0x4a   :  { %v111_v8 = vmul.f32 %v110_v19, %v108_v23  ;;  %v310_v31 = vshrl.u32 %v292_v25, %v308_v27  ;;  %v313_v32 = vadd.s32 127, %v312_v29  ;;  %v470_v29 = vmul.f32 6.0, %v598_v1 }
  0x4b   :  { %vm438_vm9 = vcmp.eq.s32.totalorder %v433_v62, 2  ;;  %vm435_vm12 = vcmp.eq.s32.totalorder %v433_v62, 0 }
  0x4c   :  { %v112_v28 = vxor.u32 2147483648, %v111_v8  ;;  %v311_v36 = vor.u32 %v310_v31, %v309_v21  ;;  %v314_v37 = vshll.u32 %v313_v32, 23  ;;  %v456_v21 = vmul.f32 2.0, %v664_v7 }
  0x4d   :  { %v454_v31 = vmul.f32 2.0, %v680_v38 }
  0x4e   :  { %v113_v33 = vsel %vm30_vm14, %v112_v28, %v111_v8  ;;  %v315_v4 = vor.u32 4788187, %v314_v37  ;;  %v318_v22 = vcvt.s32.f32 %v311_v36  ;;  %vm331_vm14 = vcmp.lt.s32.totalorder %v330_v63, 2 }
  0x4f   :  { %v116_v35 = vsel %vm669_vm15, %v602_v2, %v113_v33  ;;  %vm434_vm15 = vcmp.lt.s32.totalorder %v433_v62, 2 }
  0x50   :  { %529 = vcosq.f32 %v116_v35  ;;  %v316_v40 = vand.u32 2147483647, %v315_v4 }
  0x51   :  { %531 = vsinq.f32 %v116_v35  ;;  %v462_v35 = vmul.f32 2.0, %v596_v0 }
  0x52   :  { %v319_v42 = vmul.f32 %v318_v22, %v316_v40  ;;  %533 = vpow2.f32 %v445_v45 }
  0x54   :  { %v320_v48 = vxor.u32 2147483648, %v319_v42 }
  0x56   :  { %v321_v49 = vsel %vm238_vm0, %v320_v48, %v319_v42 }
  0x57   :  { %v324_v51 = vsel %vm237_vm1, %v608_v6, %v321_v49 }
  0x58   :  { %535 = vcosq.f32 %v324_v51 }
  0x59   :  { %537 = vsinq.f32 %v324_v51 }
  0x5a   :  { %539 = vpow2.f32 %v449_v58 }
  0x5d   :  { %v530_v54 = vpop.eup %529 }
  0x5e   :  { %v532_v55 = vpop.eup %531  ;;  %v128_v56 = vxor.u32 2147483648, %v530_v54 }
  0x5f   :  { %v125_v59 = vxor.u32 2147483648, %v532_v55  ;;  %v534_v5 = vpop.eup %533 }
  0x60   :  { %v129_v57 = vsel %vm127_vm3, %v128_v56, %v532_v55  ;;  %v232_v13 = vsel %vm230_vm7, %v128_v56, %v532_v55 }
  0x61   :  { %v126_v61 = vsel %vm124_vm2, %v530_v54, %v125_v59  ;;  %v229_v12 = vsel %vm227_vm6, %v530_v54, %v125_v59 }
  0x62   :  { %v130_v3 = vsel %vm123_vm4, %v126_v61, %v129_v57  ;;  %v233_v18 = vsel %vm226_vm8, %v229_v12, %v232_v13 }
  0x63   :  { %v131_v11 = vsel %vm120_vm5, nan, %v130_v3  ;;  %v234_v26 = vsel %vm120_vm5, nan, %v233_v18 }
  0x64   :  { %v451_v23 = vmul.f32 %v534_v5, %v131_v11 }
  0x65   :  { %v536_v10 = vpop.eup %535 }
  0x66   :  { %v538_v14 = vpop.eup %537  ;;  %v336_v15 = vxor.u32 2147483648, %v536_v10 }
  0x67   :  { %v333_v17 = vxor.u32 2147483648, %v538_v14  ;;  %v540_v32 = vpop.eup %539 }
  0x68   :  { %v337_v19 = vsel %vm335_vm10, %v336_v15, %v538_v14  ;;  %v440_v20 = vsel %vm438_vm9, %v336_v15, %v538_v14  ;;  %v455_v2 = vmul.f32 %v540_v32, %v454_v31 }
  0x69   :  { %v334_v25 = vsel %vm332_vm11, %v536_v10, %v333_v17  ;;  %v437_v8 = vsel %vm435_vm12, %v536_v10, %v333_v17 }
  0x6a   :  { %v338_v24 = vsel %vm331_vm14, %v334_v25, %v337_v19  ;;  %v441_v27 = vsel %vm434_vm15, %v437_v8, %v440_v20 }
  0x6b   :  { %v339_v28 = vsel %vm328_vm13, nan, %v338_v24  ;;  %v442_v30 = vsel %vm328_vm13, nan, %v441_v27 }
  0x6c   :  { %v452_v33 = vmul.f32 %v534_v5, %v442_v30  ;;  %v453_v34 = vmul.f32 %v451_v23, %v442_v30  ;;  %v471_v36 = vmul.f32 %v451_v23, %v339_v28 }
  0x6e   :  { %v457_v7 = vmul.f32 %v456_v21, %v453_v34  ;;  %v458_v37 = vsub.f32 0.0, %v453_v34  ;;  %v463_v16 = vmul.f32 %v452_v33, %v234_v26  ;;  %v472_v4 = vmul.f32 %v471_v36, %v470_v29 }
  0x70   :  { %v459_v22 = vsub.f32 %v458_v37, %v540_v32  ;;  %v461_v39 = vmul.f32 %v457_v7, %v598_v1  ;;  %v464_v40 = vmul.f32 %v463_v16, %v462_v35  ;;  %v469_v6 = vmul.f32 %v457_v7, %v596_v0 }
  0x72   :  { %460 = vst [vmem:[#allocation5] sm:$0xff] %v459_v22  ;;  %v465_v38 = vsub.f32 %v461_v39, %v464_v40  ;;  %v473_v41 = vadd.f32 %v472_v4, %v469_v6 }
  0x74   :  { %v466_v42 = vadd.f32 %v465_v38, %v455_v2  ;;  %v474_v43 = vadd.f32 %v473_v41, %v455_v2 }
  0x76   :  { %468 = vst [vmem:[#allocation5 + $0x8] sm:$0xff] %v466_v42  ;;  %476 = vst [vmem:[#allocation5 + $0x10] sm:$0xff] %v474_v43 }
  0x77   :  { %560 = shalt.err (!%p557_p4)
}
  0x78   :  { %s581_s13 = smov 128   ;;  %s582_s14 = smov 8  }
  0x79   :  { %488 = dma.vmem_to_hbm [thread:$0]  %s483_s11, 384, %s711_s1, [#allocation3], %s581_s13, %s581_s13, %s582_s14  }
  0x7a   :  { %571 = dma.done.wait [#allocation3], 384  }
  0x7b   :  { %572 = vsyncadd [#allocation3], 4294966912 }
  0x7c   :  { %492 = vsyncpa [#allocation3], 1 }
  0x7d   :  { %493 = vsyncpa [#allocation4], 1 }

</bundles_post_ra>
